<compile_context>
chip_gen: v5e
topology: v5e:2x2
jax: 0.10.0
libtpu: 0.0.40
codegen_flags: <defaults>
</compile_context>

<pallas_src>
import numpy as np
import jax
import jax.numpy as jnp
from jax import lax
from jax.experimental import pallas as pl
from jax.experimental.pallas import tpu as pltpu


# ------------------------------ tiling helper --------------------------------
def _choose_spatial_tile(size, per_pos_bytes, budget=8 * 1024 * 1024):
    """Largest lane-axis tile (multiple of 128 dividing `size`, or `size`)
    whose double-buffered working set stays under `budget` bytes."""
    max_ts = max(128, budget // (2 * max(per_pos_bytes, 1)))
    if size <= max_ts:
        return size
    ts = (max_ts // 128) * 128
    while ts >= 128:
        if size % ts == 0:
            return ts
        ts -= 128
    return size  # no aligned divisor found: fall back to a single block


# ----------------------------------------------------------------------------
# Kernel 1: fused attention gate (per batch, tiled over the theta grid St).
#   s = sigmoid( psi( relu( theta(x) + up(phi(g)) + up(theta_pet(pet)) ) ) )
# Layout: channels on sublanes, spatial on the 128-lane axis.
# ----------------------------------------------------------------------------
def _gate_kernel(xpat_ref, petpat_ref, g_ref, wth_ref, wtp_ref, wphi_ref,
                 bphi_ref, mphiT_ref, mpetT_ref, wpsi_ref, bpsi_ref, s_ref):
    f32 = jnp.float32
    # 2x2x2/stride-2 convs as (Ci, K) @ (K, St) matmuls (bf16 or f32 operands,
    # f32 accumulation); 1x1x1 conv on g likewise.
    theta = jnp.dot(wth_ref[...], xpat_ref[0], preferred_element_type=f32)     # (Ci, TSt)
    pet_c = jnp.dot(wtp_ref[...], petpat_ref[0], preferred_element_type=f32)   # (Ci, Sp)
    phi_c = (jnp.dot(wphi_ref[...], g_ref[0], preferred_element_type=f32)
             + bphi_ref[...])                                                  # (Ci, Sg)
    # Trilinear (align_corners=True) upsample onto the theta grid.  The gating
    # / pet grids are coarse, so a dense kron matrix on this side stays small.
    phi_up = jnp.dot(phi_c, mphiT_ref[...], preferred_element_type=f32)        # (Ci, TSt)
    pet_up = jnp.dot(pet_c, mpetT_ref[...], preferred_element_type=f32)        # (Ci, TSt)
    f = jnp.maximum(theta + phi_up + pet_up, 0.0)                              # ReLU (f32)
    # psi 1x1 conv: (1, Ci) @ (Ci, TSt) -> lane-dense (1, TSt); bias from SMEM.
    logit = jnp.dot(wpsi_ref[...], f, preferred_element_type=f32) + bpsi_ref[0, 0]
    s_ref[0] = jax.nn.sigmoid(logit)


def attention_gate(xpat, petpat, g_cf, w_theta, w_tpet, w_phi, b_phi,
                   m_phi_T, m_pet_T, w_psi, b_psi):
    B, K_x, St = xpat.shape
    _, K_p, Sp = petpat.shape
    _, Cg, Sg = g_cf.shape
    Ci = w_theta.shape[0]
    per_pos = (K_x * xpat.dtype.itemsize + (Sg + Sp) * 4 + 4 + 8 * Ci * 4)
    TSt = _choose_spatial_tile(St, per_pos)
    n_t = St // TSt
    return pl.pallas_call(
        _gate_kernel,
        out_shape=jax.ShapeDtypeStruct((B, 1, St), jnp.float32),
        grid=(B, n_t),
        in_specs=[
            pl.BlockSpec((1, K_x, TSt), lambda b, t: (b, 0, t)),
            pl.BlockSpec((1, K_p, Sp), lambda b, t: (b, 0, 0)),
            pl.BlockSpec((1, Cg, Sg), lambda b, t: (b, 0, 0)),
            pl.BlockSpec((Ci, K_x), lambda b, t: (0, 0)),
            pl.BlockSpec((Ci, K_p), lambda b, t: (0, 0)),
            pl.BlockSpec((Ci, Cg), lambda b, t: (0, 0)),
            pl.BlockSpec((Ci, 1), lambda b, t: (0, 0)),
            pl.BlockSpec((Sg, TSt), lambda b, t: (0, t)),
            pl.BlockSpec((Sp, TSt), lambda b, t: (0, t)),
            pl.BlockSpec((1, Ci), lambda b, t: (0, 0)),
            pl.BlockSpec(memory_space=pltpu.MemorySpace.SMEM),  # b_psi scalar
        ],
        out_specs=pl.BlockSpec((1, 1, TSt), lambda b, t: (b, 0, t)),
        compiler_params=pltpu.CompilerParams(
            dimension_semantics=("parallel", "parallel")),
    )(xpat, petpat, g_cf, w_theta, w_tpet, w_phi, b_phi,
      m_phi_T, m_pet_T, w_psi, b_psi)


# ----------------------------------------------------------------------------
# Kernel 2: separable upsample of the single-channel gate:
#   (Dt, Ht*Wt) --Md(D,Dt)--> (D, Ht*Wt) --kron(Mh,Mw)^T--> (D, H*W)
# Both matmuls are 2D and lane-dense; no (S, St) dense matrix is ever built.
# ----------------------------------------------------------------------------
def _upsample_kernel(s_ref, md_ref, mhwT_ref, o_ref):
    a = jnp.dot(md_ref[...], s_ref[0], preferred_element_type=jnp.float32)     # (D, HtWt)
    o_ref[0] = jnp.dot(a, mhwT_ref[...], preferred_element_type=jnp.float32)   # (D, H*W)


def upsample_gate(s3, md_up, mhw_up_T):
    B, Dt, HtWt = s3.shape
    D = md_up.shape[0]
    HW = mhw_up_T.shape[1]
    return pl.pallas_call(
        _upsample_kernel,
        out_shape=jax.ShapeDtypeStruct((B, D, HW), jnp.float32),
        grid=(B,),
        in_specs=[pl.BlockSpec((1, Dt, HtWt), lambda b: (b, 0, 0)),
                  pl.BlockSpec((D, Dt), lambda b: (0, 0)),
                  pl.BlockSpec((HtWt, HW), lambda b: (0, 0))],
        out_specs=pl.BlockSpec((1, D, HW), lambda b: (b, 0, 0)),
        compiler_params=pltpu.CompilerParams(
            dimension_semantics=("parallel",)),
    )(s3, md_up, mhw_up_T)


# ----------------------------------------------------------------------------
# Kernel 3: gated output, tiled over the spatial axis.
#   out = W_fold @ (s_up * x) + b_fold        (BN eval already folded into W)
# x, out: (Cin, TS) lane-dense tiles; gating multiply in f32 on the VPU.
# ----------------------------------------------------------------------------
def _gated_output_kernel(x_ref, s_ref, w_ref, b_ref, o_ref):
    y = x_ref[0].astype(jnp.float32) * s_ref[0]                       # (Cin, TS)
    out = jnp.dot(w_ref[...], y.astype(w_ref.dtype),
                  preferred_element_type=jnp.float32) + b_ref[...]    # (Cout, TS)
    o_ref[0] = out


def gated_output(x_cf, s_up, w_fold, b_fold):
    B, Cin, S = x_cf.shape
    Cout = w_fold.shape[0]
    per_pos = Cin * x_cf.dtype.itemsize + Cout * 4 + 4
    TS = _choose_spatial_tile(S, per_pos)
    n_s = S // TS
    return pl.pallas_call(
        _gated_output_kernel,
        out_shape=jax.ShapeDtypeStruct((B, Cout, S), jnp.float32),
        grid=(B, n_s),
        in_specs=[pl.BlockSpec((1, Cin, TS), lambda b, s: (b, 0, s)),
                  pl.BlockSpec((1, 1, TS), lambda b, s: (b, 0, s)),
                  pl.BlockSpec((Cout, Cin), lambda b, s: (0, 0)),
                  pl.BlockSpec((Cout, 1), lambda b, s: (0, 0))],
        out_specs=pl.BlockSpec((1, Cout, TS), lambda b, s: (b, 0, s)),
        compiler_params=pltpu.CompilerParams(
            dimension_semantics=("parallel", "parallel"),
            vmem_limit_bytes=32 * 1024 * 1024),
    )(x_cf, s_up, w_fold, b_fold)


# -------------------------- helpers (plain JAX / numpy) -----------------------
def _interp_matrix_1d(n_in, n_out):
    # 1-D linear interpolation weights, align_corners=True semantics.
    M = np.zeros((n_out, n_in), dtype=np.float32)
    for i in range(n_out):
        coord = 0.0 if n_out == 1 else i * (n_in - 1) / (n_out - 1)
        i0 = min(int(np.floor(coord)), n_in - 1)
        i1 = min(i0 + 1, n_in - 1)
        w1 = coord - i0
        M[i, i0] += 1.0 - w1
        M[i, i1] += w1
    return M


def _trilinear_factors(in_size, out_size):
    Md = _interp_matrix_1d(int(in_size[0]), int(out_size[0]))
    Mh = _interp_matrix_1d(int(in_size[1]), int(out_size[1]))
    Mw = _interp_matrix_1d(int(in_size[2]), int(out_size[2]))
    return Md, Mh, Mw


def _extract_222_patches_cf(v):
    # v: (B, C, D, H, W) -> (B, C*8, (D/2)(H/2)(W/2)),
    # patch-channel order (c, kd, kh, kw) matching the conv weight flattening,
    # spatial on the trailing (lane) axis.
    B, C, D, H, W = v.shape
    v = v.reshape(B, C, D // 2, 2, H // 2, 2, W // 2, 2)
    v = v.transpose(0, 1, 3, 5, 7, 2, 4, 6)        # (B, C, kd, kh, kw, d, h, w)
    return v.reshape(B, C * 8, (D // 2) * (H // 2) * (W // 2))


def init_params(key, in_channels, pet_channels, gating_channels, inter_channels):
    ks = jax.random.split(key, 12)

    def nrm(k, shape, scale=0.1):
        return jax.random.normal(k, shape, jnp.float32) * scale

    return dict(
        w_theta=nrm(ks[0], (inter_channels, in_channels, 2, 2, 2)),
        w_theta_pet=nrm(ks[1], (inter_channels, pet_channels, 2, 2, 2)),
        w_phi=nrm(ks[2], (inter_channels, gating_channels, 1, 1, 1)),
        b_phi=nrm(ks[3], (inter_channels,)),
        w_psi=nrm(ks[4], (1, inter_channels, 1, 1, 1)),
        b_psi=nrm(ks[5], (1,)),
        w_W=nrm(ks[6], (in_channels, in_channels, 1, 1, 1)),
        b_W=nrm(ks[7], (in_channels,)),
        bn_gamma=1.0 + nrm(ks[8], (in_channels,)),
        bn_beta=nrm(ks[9], (in_channels,)),
        bn_mean=nrm(ks[10], (in_channels,)),
        bn_var=1.0 + jnp.abs(nrm(ks[11], (in_channels,))),
    )


# ------------------------------ forward path ---------------------------------
def pet_attention_forward(x, g, pet, params, eps=1e-5,
                          compute_dtype=jnp.float32):
    """compute_dtype: dtype of MXU matmul operands (f32 or bf16); accumulation
    and all element-wise math stay in f32."""
    B, Cin, D, H, W = x.shape
    Ci = params['w_theta'].shape[0]
    Cg = g.shape[1]
    Cp = pet.shape[1]
    Dt, Ht, Wt = D // 2, H // 2, W // 2
    St, S = Dt * Ht * Wt, D * H * W
    Dg, Hg, Wg = g.shape[2:]
    Sg = Dg * Hg * Wg
    Dp, Hp, Wp = pet.shape[2] // 2, pet.shape[3] // 2, pet.shape[4] // 2
    Sp = Dp * Hp * Wp
    cdt = compute_dtype

    # ---- lane-dense (channels-first) operands for the fused gate kernel -----
    xpat = _extract_222_patches_cf(x).astype(cdt)            # (B, Cin*8, St)
    petpat = _extract_222_patches_cf(pet).astype(cdt)        # (B, Cp*8,  Sp)
    g_cf = g.reshape(B, Cg, Sg).astype(cdt)                  # (B, Cg,    Sg)

    w_theta = params['w_theta'].reshape(Ci, Cin * 8).astype(cdt)
    w_tpet = params['w_theta_pet'].reshape(Ci, Cp * 8).astype(cdt)
    w_phi = params['w_phi'][:, :, 0, 0, 0].astype(cdt)       # (Ci, Cg)
    b_phi = params['b_phi'].reshape(Ci, 1).astype(jnp.float32)
    w_psi = params['w_psi'][:, :, 0, 0, 0].astype(jnp.float32)   # (1, Ci)
    b_psi = params['b_psi'].reshape(1, 1).astype(jnp.float32)    # SMEM scalar

    # trilinear (align_corners=True) interpolation factors
    Mdp, Mhp, Mwp = _trilinear_factors((Dg, Hg, Wg), (Dt, Ht, Wt))
    m_phi_T = jnp.asarray(np.kron(Mdp, np.kron(Mhp, Mwp)).T)     # (Sg, St)
    Mdq, Mhq, Mwq = _trilinear_factors((Dp, Hp, Wp), (Dt, Ht, Wt))
    m_pet_T = jnp.asarray(np.kron(Mdq, np.kron(Mhq, Mwq)).T)     # (Sp, St)
    Mdu, Mhu, Mwu = _trilinear_factors((Dt, Ht, Wt), (D, H, W))
    md_up = jnp.asarray(Mdu)                                     # (D, Dt)
    mhw_up_T = jnp.asarray(np.kron(Mhu, Mwu).T)                  # (Ht*Wt, H*W)

    # ---- fused gate: theta / theta_pet / phi / interp / relu / psi / sigmoid
    s = attention_gate(xpat, petpat, g_cf, w_theta, w_tpet, w_phi, b_phi,
                       m_phi_T, m_pet_T, w_psi, b_psi)           # (B, 1, St)

    # ---- D-separable + HW-kron upsample of the single-channel gate ----------
    s3 = s.reshape(B, Dt, Ht * Wt)
    s_up = upsample_gate(s3, md_up, mhw_up_T).reshape(B, 1, S)   # (B, 1, S)

    # ---- fold BatchNorm (eval) into the W 1x1 conv ---------------------------
    scale = params['bn_gamma'] / jnp.sqrt(params['bn_var'] + eps)
    w_fold = (scale[:, None] * params['w_W'][:, :, 0, 0, 0]).astype(cdt)
    b_fold = (params['b_W'] * scale + params['bn_beta']
              - params['bn_mean'] * scale).reshape(Cin, 1).astype(jnp.float32)

    # ---- gated output, tiled over S ------------------------------------------
    x_cf = x.reshape(B, Cin, S).astype(cdt)                      # free reshape
    out_cf = gated_output(x_cf, s_up, w_fold, b_fold)            # (B, Cin, S)
    return out_cf.reshape(B, Cin, D, H, W)


# ------------------------ pure-JAX reference (NCDHW) --------------------------
def reference_forward(x, g, pet, params, eps=1e-5):
    P = lax.Precision.HIGHEST

    def conv1x1(v, w, b=None):
        out = jnp.einsum('oi,bidhw->bodhw', w[:, :, 0, 0, 0], v, precision=P)
        if b is not None:
            out = out + b[None, :, None, None, None]
        return out

    def conv222_s2(v, w):
        return lax.conv_general_dilated(
            v, w, window_strides=(2, 2, 2), padding='VALID',
            dimension_numbers=('NCDHW', 'OIDHW', 'NCDHW'), precision=P)

    def interp3(v, out_size):
        Md, Mh, Mw = _trilinear_factors(v.shape[2:], out_size)
        v = jnp.einsum('od,bcdhw->bcohw', jnp.asarray(Md), v, precision=P)
        v = jnp.einsum('oh,bcdhw->bcdow', jnp.asarray(Mh), v, precision=P)
        v = jnp.einsum('ow,bcdhw->bcdho', jnp.asarray(Mw), v, precision=P)
        return v

    theta_x = conv222_s2(x, params['w_theta'])
    out_sz = theta_x.shape[2:]
    phi_g = interp3(conv1x1(g, params['w_phi'], params['b_phi']), out_sz)
    pet_g = interp3(conv222_s2(pet, params['w_theta_pet']), out_sz)
    f = jax.nn.relu(theta_x + phi_g + pet_g)
    sigm = jax.nn.sigmoid(conv1x1(f, params['w_psi'], params['b_psi']))
    sigm = interp3(sigm, x.shape[2:])
    y = sigm * x
    wy = conv1x1(y, params['w_W'], params['b_W'])
    scale = params['bn_gamma'] / jnp.sqrt(params['bn_var'] + eps)
    shift = params['bn_beta'] - params['bn_mean'] * scale
    return wy * scale[None, :, None, None, None] + shift[None, :, None, None, None]


if __name__ == "__main__":
    B = 2
    in_channels, pet_channels, gating_channels = 8, 4, 8
    inter_channels = in_channels // 2   # module default (inter_channels=None)

    key = jax.random.PRNGKey(0)
    kx, kg, kp, kparam = jax.random.split(key, 4)
    x = jax.random.normal(kx, (B, in_channels, 8, 8, 8), jnp.float32)
    g = jax.random.normal(kg, (B, gating_channels, 2, 2, 2), jnp.float32)
    pet = jax.random.normal(kp, (B, pet_channels, 4, 4, 4), jnp.float32)
    params = init_params(kparam, in_channels, pet_channels, gating_channels,
                         inter_channels)

    ref = reference_forward(x, g, pet, params)

    # f32 path: tight tolerance.
    out_f32 = jax.block_until_ready(
        pet_attention_forward(x, g, pet, params, compute_dtype=jnp.float32))
    assert out_f32.shape == ref.shape == x.shape
    err_f32 = float(jnp.max(jnp.abs(out_f32 - ref)))
    assert err_f32 < 1e-3, f"f32 mismatch vs reference, max abs err = {err_f32}"

    # bf16 matmul-operand path (v5e/v6e/v7x MXU-friendly): loose sanity bound.
    out_bf16 = jax.block_until_ready(
        pet_attention_forward(x, g, pet, params, compute_dtype=jnp.bfloat16))
    err_bf16 = float(jnp.max(jnp.abs(out_bf16 - ref)))
    assert err_bf16 < 2.5e-1, f"bf16 sanity check failed, max abs err = {err_bf16}"

    print("KERNEL_OK")
</pallas_src>

<mosaic_0001>
module attributes {stable_mosaic.version = 11 : i64} {
  func.func @_gate_kernel(%arg0: i32, %arg1: i32, %arg2: memref<1x64x64xf32, #tpu.memory_space<vmem>>, %arg3: memref<1x32x8xf32, #tpu.memory_space<vmem>>, %arg4: memref<1x8x8xf32, #tpu.memory_space<vmem>>, %arg5: memref<4x64xf32, #tpu.memory_space<vmem>>, %arg6: memref<4x32xf32, #tpu.memory_space<vmem>>, %arg7: memref<4x8xf32, #tpu.memory_space<vmem>>, %arg8: memref<4x1xf32, #tpu.memory_space<vmem>>, %arg9: memref<8x64xf32, #tpu.memory_space<vmem>>, %arg10: memref<8x64xf32, #tpu.memory_space<vmem>>, %arg11: memref<1x4xf32, #tpu.memory_space<vmem>>, %arg12: memref<1x1xf32, #tpu.memory_space<smem>>, %arg13: memref<1x1x64xf32, #tpu.memory_space<vmem>>) attributes {dimension_semantics = [#tpu.dimension_semantics<parallel>, #tpu.dimension_semantics<parallel>], iteration_bounds = array<i64: 2, 1>, scalar_prefetch = 0 : i64, scratch_operands = 0 : i64, tpu.core_type = #tpu.core_type<tc>, window_params = [{transform_indices = @transform_0, window_bounds = array<i64: 1, 64, 64>}, {transform_indices = @transform_1, window_bounds = array<i64: 1, 32, 8>}, {transform_indices = @transform_2, window_bounds = array<i64: 1, 8, 8>}, {pipeline_mode = #tpu.pipeline_mode<synchronous>, transform_indices = @transform_3, window_bounds = array<i64: 4, 64>}, {pipeline_mode = #tpu.pipeline_mode<synchronous>, transform_indices = @transform_4, window_bounds = array<i64: 4, 32>}, {pipeline_mode = #tpu.pipeline_mode<synchronous>, transform_indices = @transform_5, window_bounds = array<i64: 4, 8>}, {pipeline_mode = #tpu.pipeline_mode<synchronous>, transform_indices = @transform_6, window_bounds = array<i64: 4, 1>}, {transform_indices = @transform_7, window_bounds = array<i64: 8, 64>}, {transform_indices = @transform_8, window_bounds = array<i64: 8, 64>}, {pipeline_mode = #tpu.pipeline_mode<synchronous>, transform_indices = @transform_9, window_bounds = array<i64: 1, 4>}, {transform_indices = @transform_10, window_bounds = array<i64: 1, 1>}, {transform_indices = @transform_11, window_bounds = array<i64: 1, 1, 64>}]} {
    %c0 = arith.constant 0 : index
    %c0_0 = arith.constant 0 : index
    %0 = vector.load %arg5[%c0, %c0_0] : memref<4x64xf32, #tpu.memory_space<vmem>>, vector<4x64xf32>
    %c0_1 = arith.constant 0 : index
    %c0_2 = arith.constant 0 : index
    %c0_3 = arith.constant 0 : index
    %1 = vector.load %arg2[%c0_1, %c0_2, %c0_3] : memref<1x64x64xf32, #tpu.memory_space<vmem>>, vector<1x64x64xf32>
    %2 = vector.shape_cast %1 : vector<1x64x64xf32> to vector<64x64xf32>
    %cst = arith.constant dense<0.000000e+00> : vector<4x64xf32>
    %3 = tpu.matmul %0, %2, %cst {dimension_numbers = #tpu.dot_dimension_numbers<[1], [0], [0], [1], [0, 0, 1, 1], [], []>} : vector<4x64xf32>, vector<64x64xf32>, vector<4x64xf32> -> vector<4x64xf32>
    %c0_4 = arith.constant 0 : index
    %c0_5 = arith.constant 0 : index
    %4 = vector.load %arg6[%c0_4, %c0_5] : memref<4x32xf32, #tpu.memory_space<vmem>>, vector<4x32xf32>
    %c0_6 = arith.constant 0 : index
    %c0_7 = arith.constant 0 : index
    %c0_8 = arith.constant 0 : index
    %5 = vector.load %arg3[%c0_6, %c0_7, %c0_8] : memref<1x32x8xf32, #tpu.memory_space<vmem>>, vector<1x32x8xf32>
    %6 = vector.shape_cast %5 : vector<1x32x8xf32> to vector<32x8xf32>
    %cst_9 = arith.constant dense<0.000000e+00> : vector<4x8xf32>
    %7 = tpu.matmul %4, %6, %cst_9 {dimension_numbers = #tpu.dot_dimension_numbers<[1], [0], [0], [1], [0, 0, 1, 1], [], []>} : vector<4x32xf32>, vector<32x8xf32>, vector<4x8xf32> -> vector<4x8xf32>
    %c0_10 = arith.constant 0 : index
    %c0_11 = arith.constant 0 : index
    %8 = vector.load %arg7[%c0_10, %c0_11] : memref<4x8xf32, #tpu.memory_space<vmem>>, vector<4x8xf32>
    %c0_12 = arith.constant 0 : index
    %c0_13 = arith.constant 0 : index
    %c0_14 = arith.constant 0 : index
    %9 = vector.load %arg4[%c0_12, %c0_13, %c0_14] : memref<1x8x8xf32, #tpu.memory_space<vmem>>, vector<1x8x8xf32>
    %10 = vector.shape_cast %9 : vector<1x8x8xf32> to vector<8x8xf32>
    %cst_15 = arith.constant dense<0.000000e+00> : vector<4x8xf32>
    %11 = tpu.matmul %8, %10, %cst_15 {dimension_numbers = #tpu.dot_dimension_numbers<[1], [0], [0], [1], [0, 0, 1, 1], [], []>} : vector<4x8xf32>, vector<8x8xf32>, vector<4x8xf32> -> vector<4x8xf32>
    %c0_16 = arith.constant 0 : index
    %c0_17 = arith.constant 0 : index
    %12 = vector.load %arg8[%c0_16, %c0_17] : memref<4x1xf32, #tpu.memory_space<vmem>>, vector<4x1xf32>
    %13 = vector.broadcast %12 : vector<4x1xf32> to vector<4x8xf32>
    %14 = arith.addf %11, %13 : vector<4x8xf32>
    %c0_18 = arith.constant 0 : index
    %c0_19 = arith.constant 0 : index
    %15 = vector.load %arg9[%c0_18, %c0_19] : memref<8x64xf32, #tpu.memory_space<vmem>>, vector<8x64xf32>
    %cst_20 = arith.constant dense<0.000000e+00> : vector<4x64xf32>
    %16 = tpu.matmul %14, %15, %cst_20 {dimension_numbers = #tpu.dot_dimension_numbers<[1], [0], [0], [1], [0, 0, 1, 1], [], []>} : vector<4x8xf32>, vector<8x64xf32>, vector<4x64xf32> -> vector<4x64xf32>
    %c0_21 = arith.constant 0 : index
    %c0_22 = arith.constant 0 : index
    %17 = vector.load %arg10[%c0_21, %c0_22] : memref<8x64xf32, #tpu.memory_space<vmem>>, vector<8x64xf32>
    %cst_23 = arith.constant dense<0.000000e+00> : vector<4x64xf32>
    %18 = tpu.matmul %7, %17, %cst_23 {dimension_numbers = #tpu.dot_dimension_numbers<[1], [0], [0], [1], [0, 0, 1, 1], [], []>} : vector<4x8xf32>, vector<8x64xf32>, vector<4x64xf32> -> vector<4x64xf32>
    %19 = arith.addf %3, %16 : vector<4x64xf32>
    %20 = arith.addf %19, %18 : vector<4x64xf32>
    %cst_24 = arith.constant 0.000000e+00 : f32
    %21 = vector.broadcast %cst_24 : f32 to vector<4x64xf32>
    %22 = arith.maximumf %20, %21 : vector<4x64xf32>
    %c0_25 = arith.constant 0 : index
    %c0_26 = arith.constant 0 : index
    %23 = vector.load %arg11[%c0_25, %c0_26] : memref<1x4xf32, #tpu.memory_space<vmem>>, vector<1x4xf32>
    %cst_27 = arith.constant dense<0.000000e+00> : vector<1x64xf32>
    %24 = tpu.matmul %23, %22, %cst_27 {dimension_numbers = #tpu.dot_dimension_numbers<[1], [0], [0], [1], [0, 0, 1, 1], [], []>} : vector<1x4xf32>, vector<4x64xf32>, vector<1x64xf32> -> vector<1x64xf32>
    %c0_28 = arith.constant 0 : index
    %c0_29 = arith.constant 0 : index
    %25 = memref.load %arg12[%c0_28, %c0_29] : memref<1x1xf32, #tpu.memory_space<smem>>
    %26 = vector.broadcast %25 : f32 to vector<1x64xf32>
    %27 = arith.addf %24, %26 : vector<1x64xf32>
    %28 = arith.negf %27 : vector<1x64xf32>
    %29 = math.exp %28 : vector<1x64xf32>
    %cst_30 = arith.constant 1.000000e+00 : f32
    %30 = vector.broadcast %cst_30 : f32 to vector<1x64xf32>
    %31 = arith.addf %30, %29 : vector<1x64xf32>
    %32 = arith.divf %30, %31 : vector<1x64xf32>
    %c0_31 = arith.constant 0 : index
    %c0_32 = arith.constant 0 : index
    %c0_33 = arith.constant 0 : index
    %33 = vector.load %arg13[%c0_31, %c0_32, %c0_33] : memref<1x1x64xf32, #tpu.memory_space<vmem>>, vector<1x1x64xf32>
    %34 = vector.shape_cast %33 : vector<1x1x64xf32> to vector<1x64xf32>
    %35 = vector.shape_cast %32 : vector<1x64xf32> to vector<1x1x64xf32>
    tpu.vector_store %arg13[%c0_31, %c0_32, %c0_33], %35 {strides = array<i32>} : memref<1x1x64xf32, #tpu.memory_space<vmem>>, vector<1x1x64xf32>,
    return
  }
  func.func @transform_0(%arg0: i32, %arg1: i32) -> (i32, i32, i32) {
    %c0_i32 = arith.constant 0 : i32
    %c0_i32_0 = arith.constant 0 : i32
    return %arg0, %c0_i32, %arg1 : i32, i32, i32
  }
  func.func @transform_1(%arg0: i32, %arg1: i32) -> (i32, i32, i32) {
    %c0_i32 = arith.constant 0 : i32
    %c0_i32_0 = arith.constant 0 : i32
    %c0_i32_1 = arith.constant 0 : i32
    return %arg0, %c0_i32, %c0_i32_0 : i32, i32, i32
  }
  func.func @transform_2(%arg0: i32, %arg1: i32) -> (i32, i32, i32) {
    %c0_i32 = arith.constant 0 : i32
    %c0_i32_0 = arith.constant 0 : i32
    %c0_i32_1 = arith.constant 0 : i32
    return %arg0, %c0_i32, %c0_i32_0 : i32, i32, i32
  }
  func.func @transform_3(%arg0: i32, %arg1: i32) -> (i32, i32) {
    %c0_i32 = arith.constant 0 : i32
    %c0_i32_0 = arith.constant 0 : i32
    %c0_i32_1 = arith.constant 0 : i32
    return %c0_i32, %c0_i32_0 : i32, i32
  }
  func.func @transform_4(%arg0: i32, %arg1: i32) -> (i32, i32) {
    %c0_i32 = arith.constant 0 : i32
    %c0_i32_0 = arith.constant 0 : i32
    %c0_i32_1 = arith.constant 0 : i32
    return %c0_i32, %c0_i32_0 : i32, i32
  }
  func.func @transform_5(%arg0: i32, %arg1: i32) -> (i32, i32) {
    %c0_i32 = arith.constant 0 : i32
    %c0_i32_0 = arith.constant 0 : i32
    %c0_i32_1 = arith.constant 0 : i32
    return %c0_i32, %c0_i32_0 : i32, i32
  }
  func.func @transform_6(%arg0: i32, %arg1: i32) -> (i32, i32) {
    %c0_i32 = arith.constant 0 : i32
    %c0_i32_0 = arith.constant 0 : i32
    %c0_i32_1 = arith.constant 0 : i32
    return %c0_i32, %c0_i32_0 : i32, i32
  }
  func.func @transform_7(%arg0: i32, %arg1: i32) -> (i32, i32) {
    %c0_i32 = arith.constant 0 : i32
    %c0_i32_0 = arith.constant 0 : i32
    return %c0_i32, %arg1 : i32, i32
  }
  func.func @transform_8(%arg0: i32, %arg1: i32) -> (i32, i32) {
    %c0_i32 = arith.constant 0 : i32
    %c0_i32_0 = arith.constant 0 : i32
    return %c0_i32, %arg1 : i32, i32
  }
  func.func @transform_9(%arg0: i32, %arg1: i32) -> (i32, i32) {
    %c0_i32 = arith.constant 0 : i32
    %c0_i32_0 = arith.constant 0 : i32
    %c0_i32_1 = arith.constant 0 : i32
    return %c0_i32, %c0_i32_0 : i32, i32
  }
  func.func @transform_10(%arg0: i32, %arg1: i32) -> (i32, i32) {
    %c0_i32 = arith.constant 0 : i32
    %c0_i32_0 = arith.constant 0 : i32
    %c0_i32_1 = arith.constant 0 : i32
    return %c0_i32, %c0_i32_0 : i32, i32
  }
  func.func @transform_11(%arg0: i32, %arg1: i32) -> (i32, i32, i32) {
    %c0_i32 = arith.constant 0 : i32
    %c0_i32_0 = arith.constant 0 : i32
    return %arg0, %c0_i32, %arg1 : i32, i32, i32
  }
}

</mosaic_0001>

<bundles_post_ra>
// kernel: tpu_custom_call.1
= control target key start
LH: loop header
LB: loop body
LE: loop exit
PB: predicated region body
PF: predicated region fallthrough
CT: control target
= control target key end

     0   :  { %s1275_s0 = inlined_call_operand.hbm [shape: f32[2,64,64], index: 0, kind: input, shape index: {}]   ;;  %s1276_s1 = inlined_call_operand.vmem [shape: f32[2,32,8], index: 1, kind: input, shape index: {}]   ;;  %s1277_s2 = inlined_call_operand.vmem [shape: f32[2,8,8], index: 2, kind: input, shape index: {}]   ;;  %s1278_s3 = inlined_call_operand.vmem [shape: f32[4,64], index: 3, kind: input, shape index: {}]   ;;  %s1279_s4 = inlined_call_operand.vmem [shape: f32[4,32], index: 4, kind: input, shape index: {}]   ;;  %s1280_s5 = inlined_call_operand.vmem [shape: f32[4,8], index: 5, kind: input, shape index: {}]   ;;  %s1281_s6 = inlined_call_operand.vmem [shape: f32[4,1], index: 6, kind: input, shape index: {}]   ;;  %s1282_s7 = inlined_call_operand.vmem [shape: f32[8,64], index: 7, kind: input, shape index: {}]   ;;  %s1283_s8 = inlined_call_operand.vmem [shape: f32[8,64], index: 8, kind: input, shape index: {}]   ;;  %s1284_s9 = inlined_call_operand.vmem [shape: f32[1,4], index: 9, kind: input, shape index: {}]   ;;  %s1285_s10 = inlined_call_operand.<no memory space> [shape: f32[1,1], index: 10, kind: input, shape index: {}]   ;;  %s1286_s11 = inlined_call_operand.hbm [shape: f32[2,1,64], index: 11, kind: output, shape index: {}]  }
   0x1   :  { %16 = sst [smem:[#allocation2]] %s1285_s10 }
   0x2   :  { %17 = vsyncpa [#allocation4], 0 }
   0x3   :  { %19 = vsyncpa [#allocation4 + $0x1], 0 }
   0x4   :  { %20 = vsyncpa [#allocation5], 0 }
   0x5   :  { %22 = vsyncpa [#allocation5 + $0x1], 0  ;;  %s1112_s19 = smov 0   ;;  %s1114_s20 = smov 0  }
   0x6   :  { %s1116_s21 = smov 0   ;;  %s1118_s22 = smov 0  }
   0x7   :  { %s1120_s23 = smov 0   ;;  %s1122_s24 = smov 0  }
   0x8 LB: > { %1292 = sst [smem:[#allocation9_spill]] %s1024_s19  ;;  %s836_s10 = sadd.s32 4294967295, %s1044_s24   ;;  %s1044_s24 = sphi %s1122_s24, %s28_s24   ;;  %s1040_s23 = sphi %s1120_s23, %s1305_s23   ;;  %s1036_s22 = sphi %s1118_s22, %s1304_s22   ;;  %s1032_s21 = sphi %s1116_s21, %s1308_s21   ;;  %s1028_s20 = sphi %s1114_s20, %s1307_s20   ;;  %s1024_s19 = sphi %s1112_s19, %s1306_s19  }
   0x9   : > { %1293 = sst [smem:[#allocation10_spill]] %s1040_s23  ;;  %s837_s25 = sadd.s32 4294967294, %s1044_s24  }
   0xa   : > { %s40_s26 = sadd.s32 1, %s1040_s23  ;;  %s49_s27 = sadd.s32 1, %s1032_s21 }
   0xb   : > { %p42_p0 = scmp.ge.s32.totalorder %s40_s26, 2  ;;  %p56_p1 = scmp.ne.s32.totalorder %s1032_s21, %s1028_s20 }
   0xc   : > { %p57_p2 = scmp.eq.s32.totalorder %s1044_s24, 0  ;;  %p62_p3 = scmp.ne.s32.totalorder %s1028_s20, %s1024_s19 }
   0xd   : > { %s1310_s26 = smov (%p42_p0, %s40_s26), 0  ;;  %p63_p5 = scmp.eq.s32.totalorder %s836_s10, 0 }
   0xe   : > { %1294 = sst [smem:[#allocation11_spill]] %s1310_s26  ;;  %p1153_p4 = por %p57_p2, %p56_p1 }
   0xf   : > { %s44_s29 = ssub.s32 %s1040_s23, %s1310_s26  ;;  %p318_p6 = scmp.eq.s32.totalorder %s836_s10, 1 }
  0x10   : > { %p47_p7 = scmp.eq.s32.totalorder %s44_s29, 0  ;;  %p1159_p8 = por %p63_p5, %p62_p3 }
  0x11   : > { %p1163_p9 = por %p318_p6, %p56_p1  ;;  %p324_p10 = scmp.eq.s32.totalorder %s837_s25, 1 }
  0x12   : > { %s1168_s13 = scalar_select %p47_p7, %s1032_s21, %s49_s27  }
  0x13   : > { %s1297_s12 = scalar_select %p1163_p9, 1, 0 }
  0x14   : > { %1299 = sst [smem:[#allocation13_spill]] %s1168_s13  ;;  %p1170_p11 = por %p324_p10, %p62_p3 }
  0x15   : > { %1298 = sst [smem:[#allocation12_spill]] %s1297_s12  ;;  %p841_p12 = scmp.ge.s32.totalorder %s1044_s24, 2 }
  0x16   : > { %p874_p13 = scmp.lt.s32.totalorder %s1044_s24, 2  ;;  %s376_s15 = sand.u32 1, %s1032_s21  }
  0x17   : > { %s842_s16 = sshll.u32 %s376_s15, 6  ;;  %s860_s17 = sshll.u32 %s1040_s23, 6 }
  0x18   : > { %s386_s29 = scalar_lea.hbm %s1275_s0, %s860_s17  ;;  %s380_s26 = scalar_lea.vmem [#allocation3], %s842_s16 }
  0x19   : > { %s389_s19 = sshll.u32 %s380_s26, 4  ;;  %s387_s12 = sshll.u32 %s386_s29, 4  ;;  %s390_s19 = int_to_ptr.vmem [resolvable:$true] %s389_s19  ;;  %s388_s12 = int_to_ptr.hbm [resolvable:$true] %s387_s12 }
  0x1a   : > { %p867_p0 = pnand %p874_p13, %p1153_p4  ;;  %p845_p1 = scmp.ge.s32.totalorder %s1044_s24, 1 }
  0x1b   : > { %s377_s25 = scalar_lea.sflag [#allocation4], %s376_s15  ;;  %s1046_s27 = smov 128  }
  0x1c   : > { %s1047_s13 = smov 8   ;;  %p412_p2 = scmp.lt.s32.totalorder %s1044_s24, 3 }
  0x1d   : > { %869 = dma.hbm_to_vmem [thread:$0]  (!%p867_p0), %s388_s12, 1024, %s390_s19, %s377_s25, %s1046_s27, %s1046_s27, %s1047_s13  }
  0x1e   : > { %p413_p3 = pnand %p845_p1, %p412_p2 }
  0x1f   : > { %s1186_s23 = sand.u32 (!%p413_p3), 1, %s1028_s20  }
  0x20   : > { %416 = sbr.rel (%p413_p3) target bundleno = 484 (0x1e4), region = 64  ;;  %s846_s26 = sshll.u32 (!%p413_p3), %s1186_s23, 6 }
  0x21   : > { %s419_s16 = scalar_lea.sflag (!%p413_p3), [#allocation4], %s1186_s23  ;;  %s1190_s17 = scalar_lea.vmem (!%p413_p3), [#allocation3], %s846_s26 }
  0x25   : > { %1015 = dma.done.wait (%p1159_p8), %s419_s16, 1024  }
  0x26   : > { %1017 = vsyncadd (%p1159_p8), %s419_s16, 4294966272  ;;  %p478_p4 = scmp.lt.s32.totalorder %s1036_s22, 1  ;;  %v1048_v0 = vmov 0   ;;  %vm541_vm0 = vcmask 64512   ;;  %v533_v2 = vld [vmem:[%s1280_s5] sm:$0xf]  ;;  %s701_s16 = scalar_lea.hbm %s1286_s11, %s1036_s22 }
  0x27   : > { %927 = vset.pattern.permute.xlu0 %v1048_v0  ;;  %v535_v6 = vld [vmem:[%s1281_s6] sm:$0xf]  ;;  %v503_v7 = vld [vmem:[%s1190_s17 + $0x38] sm:$0xff]  ;;  %v502_v8 = vld [vmem:[%s1190_s17 + $0x30] sm:$0xff]  ;;  %vm509_vm1 = vcmask 261120   ;;  %vm613_vm2 = vcmask 523264  }
  0x28   : > { %s479_s19 = scalar_select %p478_p4, %s1036_s22, 1  ;;  %538 = vperm.xlu0 %927, %v535_v6   ;;  %625 = vmatpush.msra.mxu1 %v503_v7  ;;  %v504_v10 = vld [vmem:[%s1279_s4] sm:$0xf]  ;;  %v501_v11 = vld [vmem:[%s1190_s17 + $0x28] sm:$0xff]  ;;  %v499_v14 = vld [vmem:[%s1190_s17 + $0x18] sm:$0xff]  ;;  %vm646_vm3 = vcmask 1043456  }
  0x29   : > { %v500_v12 = vld [vmem:[%s1190_s17 + $0x20] sm:$0xff]  ;;  %v498_v16 = vld [vmem:[%s1190_s17 + $0x10] sm:$0xff]  ;;  %v497_v17 = vld [vmem:[%s1190_s17 + $0x8] sm:$0xff]  ;;  %vm642_vm4 = vcmask 31744   ;;  %s640_s30 = sld [smem:[#allocation2]]  ;;  %vm689_vm8 = vcmask 516096  }
  0x2a   : > { %s849_s28 = sshll.u32 %s479_s19, 3  ;;  %s861_s12 = sshll.u32 %s479_s19, 5  ;;  %626 = vmatpush.msra.mxu1 %v502_v8  ;;  %v565_v13 = vld [vmem:[%s1282_s7] sm:$0xff] }
  0x2b   : > { %s486_s18 = scalar_lea.vmem %s1277_s2, %s849_s28  ;;  %s482_s25 = scalar_lea.vmem %s1276_s1, %s861_s12  ;;  %584 = vmatpush.msra.mxu2 %v565_v13  ;;  %v589_v15 = vld [vmem:[%s1283_s8] sm:$0xff] }
  0x2c   : > { %v534_v1 = vld [vmem:[%s486_s18] sm:$0xff]  ;;  %v508_v3 = vld [vmem:[%s482_s25 + $0x18] sm:$0xff]  ;;  %v507_v4 = vld [vmem:[%s482_s25 + $0x10] sm:$0xff]  ;;  %627 = vmatpush.msra.mxu1 %v501_v11  ;;  %s477_s19 = scalar_lea.vmem [#allocation6], %s1186_s23  ;;  %s705_s12 = sshll.u32 %s701_s16, 4  ;;  %s706_s12 = int_to_ptr.hbm [resolvable:$true] %s705_s12 }
  0x2d   : > { %560 = vmatpush.msra.mxu3 %v534_v1  ;;  %525 = vmatpush.msra.mxu0 %v508_v3  ;;  %v506_v5 = vld [vmem:[%s482_s25 + $0x8] sm:$0xff]  ;;  %v505_v9 = vld [vmem:[%s482_s25] sm:$0xff]  ;;  %s703_s28 = sshll.u32 %s477_s19, 4  ;;  %s692_s22 = scalar_lea.sflag [#allocation5], %s1186_s23  ;;  %s704_s28 = int_to_ptr.vmem [resolvable:$true] %s703_s28 }
  0x2e   : > { %851 = vmatmul.msk.f32.vlgmr.msra.gmra.mxu3 %vm541_vm0, %v533_v2  ;;  %628 = vmatpush.msra.mxu1 %v500_v12  ;;  %v496_v18 = vld [vmem:[%s1190_s17] sm:$0xff]  ;;  %s976_s15 = sshra.s32 %s706_s12, 4  ;;  %s982_s17 = scalar_lea.hbm %s1286_s11, 2  ;;  %s977_s15 = int_to_ptr.hbm [resolvable:$true] %s976_s15 }
  0x2f   : > { %526 = vmatpush.msra.mxu0 %v507_v4  ;;  %608 = vmatpush.msrb.mxu3 %v589_v15  ;;  %v495_v19 = vld [vmem:[%s1278_s3] sm:$0xf]  ;;  %v641_v31 = vstv %s640_s30  ;;  %s978_s18 = scalar_lea.hbm %s977_s15, 1  ;;  %p983_p8 = scmp.lt.s32.totalorder %s977_s15, %s1286_s11 }
  0x30   : > { %629 = vmatpush.msra.mxu1 %v499_v14  ;;  %v639_v30 = vld [vmem:[%s1284_s9] sm:$0x1]  ;;  %p979_p5 = scmp.ne.s32.totalorder %s977_s15, %s978_s18  ;;  %p984_p10 = scmp.lt.s32.totalorder %s982_s17, %s978_s18 }
  0x31   : > { %527 = vmatpush.msra.mxu0 %v506_v5 }
  0x32   : > { %630 = vmatpush.msra.mxu1 %v498_v16  ;;  %p980_p6 = pnand %p979_p5, %p1163_p9  ;;  %p985_p13 = por %p984_p10, %p983_p8 }
  0x33   : > { %528 = vmatpush.msra.mxu0 %v505_v9 }
  0x34   : > { %850 = vmatmul.msk.f32.vlgmr.msra.gmra.mxu0 %vm509_vm1, %v504_v10  ;;  %631 = vmatpush.msra.mxu1 %v497_v17  ;;  %p981_p7 = pneg %p980_p6 }
  0x36   : > { %632 = vmatpush.msra.mxu1 %v496_v18  ;;  %p986_p0 = pnand %p985_p13, %p981_p7 }
  0x37   : > { %854 = vmatmul.msk.f32.vlgmr.msra.gmra.mxu1 %vm613_vm2, %v495_v19 }
  0x9a   : > { %v539_v20 = vpop.permute.xlu0 %538 }
  0xb1   : > { %v562_v21 = vpop.f32.mrf.mxu3  ;;  %v530_v22 = vpop.f32.mrf.mxu0 }
  0xb2   : > { %v563_v23 = vadd.f32 %v562_v21, %v539_v20  ;;  %853 = vmatmul.msk.f32.vlgmr.msrb.gmra.mxu3 %vm541_vm0, %v530_v22 }
  0xb4   : > { %852 = vmatmul.msk.f32.vlgmr.msra.gmra.mxu2 %vm541_vm0, %v563_v23  ;;  %v634_v24 = vpop.f32.mrf.mxu1 }
 0x135   : > { %v610_v26 = vpop.f32.mrf.mxu3 }
 0x137   : > { %v586_v25 = vpop.f32.mrf.mxu2 }
 0x138   : > { %v635_v27 = vadd.f32 %v634_v24, %v586_v25 }
 0x13a   : > { %v637_v28 = vadd.f32 %v635_v27, %v610_v26 }
 0x13c   : > { %v638_v29 = vmax.f32 %v637_v28, 0.0 }
 0x13e   : > { %855 = vmatpush.msk.msrb.mxu2 %vm646_vm3, %v638_v29 }
 0x13f   : > { %856 = vmatmul.msk.f32.vlgmr.msrb.gmra.mxu2 %vm642_vm4, %v639_v30 }
 0x1c2   : > { %v667_v32 = vpop.f32.mrf.mxu2 }
 0x1c3   : > { %v668_v33 = vadd.f32 %v667_v32, %v641_v31 }
 0x1c5   : > { %v857_v34 = vmul.f32 -1.442695, %v668_v33 }
 0x1c7   : > { %928 = vpow2.f32 %v857_v34 }
 0x1cd   : > { %v929_v35 = vpop.eup %928 }
 0x1ce   : > { %v673_v36 = vadd.f32 1.0, %v929_v35 }
 0x1d0   : > { %930 = vrcp.f32 %v673_v36  ;;  %v685_v40 = vand.u32 2147483648, %v673_v36  ;;  %v683_v42 = vand.u32 2147483647, %v673_v36  ;;  %vm679_vm6 = vweird.f32 %v673_v36 }
 0x1d2   : > { %v686_v44 = vor.u32 1.1754944e-38, %v685_v40  ;;  %vm684_vm9 = vcmp.eq.f32.partialorder %v683_v42, 8.507059e+37 }
 0x1d6   : > { %v931_v37 = vpop.eup %930 }
 0x1d7   : > { %v675_v38 = vmul.f32 %v931_v37, %v673_v36  ;;  %vm680_vm5 = vweird.f32 %v931_v37 }
 0x1d8   : > { %vm681_vm7 = vmor %vm679_vm6, %vm680_vm5 }
 0x1d9   : > { %v676_v39 = vsub.f32 1.0, %v675_v38 }
 0x1db   : > { %v677_v41 = vmul.f32 %v931_v37, %v676_v39 }
 0x1dd   : > { %v678_v43 = vadd.f32 %v931_v37, %v677_v41 }
 0x1df   : > { %v682_v45 = vsel %vm681_vm7, %v931_v37, %v678_v43 }
 0x1e0   : > { %v687_v46 = vsel %vm684_vm9, %v686_v44, %v682_v45 }
 0x1e1   : > { %690 = vst.msk [vmem:[%s477_s19] sm:$0x1] %vm689_vm8, %v687_v46 }
 0x1e2   : > { %989 = shalt.err (!%p986_p0)
}
 0x1e3   : > { %864 = dma.vmem_to_hbm [thread:$0]  (%p1163_p9), %s704_s28, 16, %s706_s12, %s692_s22  }
 0x1e4 PF: > { %s1302_s23 = sld [smem:[#allocation9_spill]]  ;;  %p871_p1 = pnand %p841_p12, %p1170_p11 }
 0x1e6   : > { %p872_p2 = pneg %p871_p1 }
 0x1ea   : > { %s717_s27 = sand.u32 1, %s1302_s23  }
 0x1eb   : > { %s718_s26 = scalar_lea.sflag [#allocation5], %s717_s27 }
 0x1ec   : > { %1019 = dma.done.wait (%p872_p2), %s718_s26, 16  }
 0x1ed   : > { %1021 = vsyncadd (%p872_p2), %s718_s26, 4294967280  ;;  %s28_s24 = sadd.s32 1, %s1044_s24   ;;  %s1303_s16 = sld [smem:[#allocation13_spill]] }
 0x1ee   : > { %p25_p3 = scmp.ge.s32.totalorder %s28_s24, 4   ;;  %s1304_s22 = sld [smem:[#allocation10_spill]] }
 0x1ef   : > { %s1305_s23 = sld [smem:[#allocation11_spill]]  ;;  %s1306_s19 = smov %s1028_s20 }
 0x1f0   : > { %s1307_s20 = smov %s1032_s21  ;;  %27 = sbr.rel (!%p25_p3) target bundleno = 8 (0x8), region = 121 }
 0x1f3   : > { %s1308_s21 = smov %s1303_s16 }
 0x1f5   :  { %723 = vsyncpa [#allocation4], 1 }
 0x1f6   :  { %725 = vsyncpa [#allocation4 + $0x1], 1 }
 0x1f7   :  { %726 = vsyncpa [#allocation5], 1 }
 0x1f8   :  { %728 = vsyncpa [#allocation5 + $0x1], 1 }

</bundles_post_ra>
